<compile_context>
chip_gen: v6e
topology: v6e:2x2x1
jax: 0.10.0
libtpu: 0.0.40
codegen_flags: <defaults>
</compile_context>

<pallas_src>
import functools

import jax
import jax.numpy as jnp
from jax.experimental import pallas as pl
from jax.experimental.pallas import tpu as pltpu

EPS = 1e-5

_MIN_BLOCK_BYTES = 1 << 20     # keep x blocks >= ~1 MiB so ~0.35us/step overhead amortizes
_SMALL_BLOCK_BYTES = 2 << 20   # below this, ask for a 3rd pipeline buffer (two-phase path)

_BUDGET_CACHE = None


def _vmem_budgets():
    """Per-generation (working-set budget, scoped-vmem limit) in bytes."""
    global _BUDGET_CACHE
    if _BUDGET_CACHE is None:
        cap = None
        try:
            cap = getattr(pltpu.get_tpu_info(), "vmem_capacity_bytes", None)
        except Exception:
            cap = None
        if not cap or cap <= 0:
            cap = 64 * 1024 * 1024            # assume the smallest (v7x per-TC) if unknown
        if cap <= 64 * 1024 * 1024:
            # v7x-class part (64 MiB / TC): stay conservative, leave headroom
            # for Mosaic-internal scratch.
            _BUDGET_CACHE = (28 * 1024 * 1024, 44 * 1024 * 1024)
        else:
            # v5e / v6e (128 MiB): use ~half the chip for the working set so
            # mid-size shapes keep the single-pass (2x traffic) path.
            _BUDGET_CACHE = (cap // 2, int(cap * 0.7))
    return _BUDGET_CACHE


# ----------------------------------------------------------------------------
# Kernels
# ----------------------------------------------------------------------------
def _bn_relu_single_pass_kernel(x_ref, gamma_ref, beta_ref, o_ref, *, inv_m):
    # x_ref: (N, tc, HWp) -- full reduction extent resident in VMEM (pad lanes zero).
    # gamma_ref / beta_ref: (tc, 1) f32.  inv_m = 1 / (N*H*W), true (unpadded) count.
    x = x_ref[...].astype(jnp.float32)
    # One-sweep stats: sum and sum-of-squares; no centered `xc` temporary.
    s = jnp.sum(jnp.sum(x, axis=0), axis=-1, keepdims=True)        # (tc, 1)
    q = jnp.sum(jnp.sum(x * x, axis=0), axis=-1, keepdims=True)    # (tc, 1)
    mean = s * inv_m
    var = jnp.maximum(q * inv_m - mean * mean, 0.0)                # biased var (train mode)
    inv_std = jax.lax.rsqrt(var + EPS)
    scale = gamma_ref[...] * inv_std                               # (tc, 1)
    shift = beta_ref[...] - mean * scale                           # (tc, 1)
    # Re-read x for the elementwise pass so the f32 copy above need not stay live.
    y = x_ref[...].astype(jnp.float32) * scale + shift
    o_ref[...] = jnp.maximum(y, 0.0).astype(o_ref.dtype)


def _bn_stats_kernel(x_ref, sum_ref, ssq_ref, sum_acc, ssq_acc):
    # Phase 1 (two-phase path): accumulate per-channel sum / sum-of-squares into
    # lane-shaped (tc, 128) f32 scratch; cross-lane reduce + narrow (tc, 1) store
    # happen only on the last H*W step.
    j = pl.program_id(1)

    @pl.when(j == 0)
    def _():
        sum_acc[...] = jnp.zeros_like(sum_acc)
        ssq_acc[...] = jnp.zeros_like(ssq_acc)

    t_hw = x_ref.shape[-1]
    assert t_hw % 128 == 0, "two-phase path requires lane-padded H*W tiles"
    n_groups = t_hw // 128

    if n_groups == 1:
        xg = x_ref[...].astype(jnp.float32)                        # (N, tc, 128)
        sum_acc[...] += jnp.sum(xg, axis=0)
        ssq_acc[...] += jnp.sum(xg * xg, axis=0)
    else:
        @pl.loop(0, n_groups, unroll=(n_groups <= 8))
        def _(g):
            off = pl.multiple_of(g * 128, 128)
            xg = x_ref[:, :, pl.ds(off, 128)].astype(jnp.float32)  # (N, tc, 128)
            sum_acc[...] += jnp.sum(xg, axis=0)
            ssq_acc[...] += jnp.sum(xg * xg, axis=0)

    @pl.when(j == pl.num_programs(1) - 1)
    def _():
        sum_ref[...] = jnp.sum(sum_acc[...], axis=-1, keepdims=True)
        ssq_ref[...] = jnp.sum(ssq_acc[...], axis=-1, keepdims=True)


def _bn_apply_kernel(x_ref, scale_ref, shift_ref, o_ref):
    # Phase 2 (two-phase path): y = max(x * scale + shift, 0)
    x = x_ref[...].astype(jnp.float32)
    o_ref[...] = jnp.maximum(x * scale_ref[...] + shift_ref[...], 0.0).astype(o_ref.dtype)


# ----------------------------------------------------------------------------
# Tile selection
# ----------------------------------------------------------------------------
def _tile_candidates(full, align):
    """Divisors of `full` that are multiples of `align`, plus the full extent.
    Descending order."""
    cands = {full}
    t = align
    while t < full:
        if full % t == 0:
            cands.add(t)
        t += align
    return sorted(cands, reverse=True)


def _footprint(n, tc, t_hw, in_bytes, out_bytes, *, in_bufs, out_bufs, f32_temps):
    # Conservative per-block VMEM estimate: pipelined input/output buffers plus
    # in-kernel f32 temporaries (upcast of x, elementwise products, ...).
    return n * tc * t_hw * (in_bufs * in_bytes + out_bufs * out_bytes + 4 * f32_temps)


def _pick_tiles(n, c, hw_pad, in_bytes, out_bytes, budget, force_two_phase):
    # Dtype-aware sublane alignment: 8 rows for f32, 16 for bf16, 32 for int8/fp8.
    sublane = max(8, 32 // in_bytes)
    tc_cands = _tile_candidates(c, sublane)        # descending
    hw_cands = _tile_candidates(hw_pad, 128)       # descending

    if not force_two_phase:
        fitting = [t for t in tc_cands
                   if _footprint(n, t, hw_pad, in_bytes, out_bytes,
                                 in_bufs=2, out_bufs=2, f32_temps=2) <= budget]
        if fitting:
            # Prefer >=4 (then >=2) channel-grid steps so both v7x TensorCores
            # get work and the pipeline has DMA to overlap, but only if blocks
            # stay >= _MIN_BLOCK_BYTES.
            for min_steps in (4, 2):
                ok = [t for t in fitting
                      if c // t >= min_steps
                      and n * t * hw_pad * in_bytes >= _MIN_BLOCK_BYTES]
                if ok:
                    return "single", ok[0], hw_pad
            return "single", fitting[0], hw_pad

    # Two-phase: keep the per-row DMA run (t_hw) as long as possible and shrink
    # the channel tile first (long contiguous runs matter most on v5e).
    for t_hw in hw_cands:
        for tc in tc_cands:
            if _footprint(n, tc, t_hw, in_bytes, out_bytes,
                          in_bufs=3, out_bufs=2, f32_temps=2) <= budget:
                return "two_phase", tc, t_hw
    # Nothing fits the requested budget: smallest legal tiles.  hw is lane
    # padded, so the smallest hw candidate is 128 and this stays small.
    return "two_phase", tc_cands[-1], hw_cands[-1]


def _x_block_spec(block_shape, index_map, *, extra_buffering):
    if extra_buffering:
        try:
            # 3-deep pipelining hides DMA issue latency for small blocks (v6e);
            # fall back silently if this JAX version lacks pipeline_mode.
            return pl.BlockSpec(block_shape, index_map, pipeline_mode=pl.Buffered(3))
        except Exception:
            pass
    return pl.BlockSpec(block_shape, index_map)


# ----------------------------------------------------------------------------
# Wrapper
# ----------------------------------------------------------------------------
def bn_relu(x_nchw, gamma, beta, *, vmem_budget_bytes=None, force_two_phase=False):
    """BatchNorm2d (training-mode batch stats, biased variance) + ReLU.

    x_nchw: (N, C, H, W); gamma, beta: (C,).  Returns (N, C, H, W).
    """
    n, c, h, w = x_nchw.shape
    hw = h * w
    budget_auto, vmem_limit = _vmem_budgets()
    budget = budget_auto if vmem_budget_bytes is None else vmem_budget_bytes

    # Free reshape (data stays in its NCHW layout).  Pad H*W up to a multiple
    # of 128 lanes so every store is unmasked / lane-dense (7x7, 14x14 layers).
    # Pad values are zero, so sums / sums-of-squares are unaffected; stats use
    # the true element count.
    x = x_nchw.reshape(n, c, hw)
    pad = (-hw) % 128
    hw_pad = hw + pad
    if pad:
        x = jnp.pad(x, ((0, 0), (0, 0), (0, pad)))

    gamma2 = gamma.reshape(c, 1).astype(jnp.float32)
    beta2 = beta.reshape(c, 1).astype(jnp.float32)

    in_bytes = x.dtype.itemsize
    out_bytes = x.dtype.itemsize
    mode, tc, t_hw = _pick_tiles(n, c, hw_pad, in_bytes, out_bytes,
                                 budget, force_two_phase)

    make_params = functools.partial(pltpu.CompilerParams, vmem_limit_bytes=vmem_limit)

    if mode == "single":
        out = pl.pallas_call(
            functools.partial(_bn_relu_single_pass_kernel,
                              inv_m=1.0 / float(n * hw)),
            out_shape=jax.ShapeDtypeStruct((n, c, hw_pad), x.dtype),
            grid=(c // tc,),
            in_specs=[
                pl.BlockSpec((n, tc, hw_pad), lambda i: (0, i, 0)),
                pl.BlockSpec((tc, 1), lambda i: (i, 0)),
                pl.BlockSpec((tc, 1), lambda i: (i, 0)),
            ],
            out_specs=pl.BlockSpec((n, tc, hw_pad), lambda i: (0, i, 0)),
            compiler_params=make_params(dimension_semantics=("parallel",)),
        )(x, gamma2, beta2)
    else:
        # ---- Two-phase path: stats accumulation, then scale/shift + ReLU. ----
        grid = (c // tc, hw_pad // t_hw)
        x_block_bytes = n * tc * t_hw * in_bytes
        extra_buf = (x_block_bytes <= _SMALL_BLOCK_BYTES
                     and grid[0] * grid[1] >= 3)

        sums, ssqs = pl.pallas_call(
            _bn_stats_kernel,
            out_shape=[jax.ShapeDtypeStruct((c, 1), jnp.float32),
                       jax.ShapeDtypeStruct((c, 1), jnp.float32)],
            grid=grid,
            in_specs=[_x_block_spec((n, tc, t_hw), lambda i, j: (0, i, j),
                                    extra_buffering=extra_buf)],
            out_specs=[pl.BlockSpec((tc, 1), lambda i, j: (i, 0)),
                       pl.BlockSpec((tc, 1), lambda i, j: (i, 0))],
            scratch_shapes=[pltpu.VMEM((tc, 128), jnp.float32),
                            pltpu.VMEM((tc, 128), jnp.float32)],
            compiler_params=make_params(
                dimension_semantics=("parallel", "arbitrary")),
        )(x)

        m = float(n * hw)  # true (unpadded) element count per channel
        mean = sums[:, 0] / m
        var = jnp.maximum(ssqs[:, 0] / m - mean * mean, 0.0)
        inv_std = jax.lax.rsqrt(var + EPS)
        scale = gamma2[:, 0] * inv_std
        shift = beta2[:, 0] - mean * scale

        out = pl.pallas_call(
            _bn_apply_kernel,
            out_shape=jax.ShapeDtypeStruct((n, c, hw_pad), x.dtype),
            grid=grid,
            in_specs=[
                _x_block_spec((n, tc, t_hw), lambda i, j: (0, i, j),
                              extra_buffering=extra_buf),
                pl.BlockSpec((tc, 1), lambda i, j: (i, 0)),
                pl.BlockSpec((tc, 1), lambda i, j: (i, 0)),
            ],
            out_specs=pl.BlockSpec((n, tc, t_hw), lambda i, j: (0, i, j)),
            compiler_params=make_params(
                dimension_semantics=("parallel", "parallel")),
        )(x, scale.reshape(c, 1), shift.reshape(c, 1))

    if pad:
        out = out[:, :, :hw]
    return out.reshape(n, c, h, w)


# ----------------------------------------------------------------------------
# Reference & test
# ----------------------------------------------------------------------------
def _reference(x_nchw_f32, gamma, beta):
    mean = jnp.mean(x_nchw_f32, axis=(0, 2, 3), keepdims=True)
    var = jnp.mean((x_nchw_f32 - mean) ** 2, axis=(0, 2, 3), keepdims=True)
    y = (x_nchw_f32 - mean) / jnp.sqrt(var + EPS)
    y = y * gamma.reshape(1, -1, 1, 1) + beta.reshape(1, -1, 1, 1)
    return jnp.maximum(y, 0.0)


if __name__ == "__main__":
    key = jax.random.PRNGKey(0)
    kx, kg, kb = jax.random.split(key, 3)

    def run_case(n, c, h, w, dtype, **kw):
        x = jax.random.normal(kx, (n, c, h, w), jnp.float32).astype(dtype)
        # nn.BatchNorm2d initializes weight=1, bias=0; perturb slightly so the
        # affine path is actually exercised (deterministic via PRNGKey(0)).
        gamma = 1.0 + 0.1 * jax.random.normal(kg, (c,), jnp.float32)
        beta = 0.1 * jax.random.normal(kb, (c,), jnp.float32)
        ref = _reference(x.astype(jnp.float32), gamma, beta)
        out = jax.block_until_ready(bn_relu(x, gamma, beta, **kw))
        tol = 1e-4 if dtype == jnp.float32 else 3e-2
        ok = jnp.allclose(out.astype(jnp.float32), ref, atol=tol, rtol=tol)
        assert ok, f"mismatch for shape=({n},{c},{h},{w}) dtype={dtype} kwargs={kw}"

    # Single-pass path at the toy mcb-block shape.
    run_case(2, 4, 16, 16, jnp.float32)
    # Two-phase path, forced with a tiny budget: multi-step stats accumulation
    # with pl.when init/finalize.
    run_case(2, 4, 16, 16, jnp.float32, force_two_phase=True, vmem_budget_bytes=1)
    # Two-phase with several H*W grid steps, multi-group lane accumulation and
    # the Buffered(3) input pipeline.
    run_case(2, 4, 32, 32, jnp.float32, force_two_phase=True,
             vmem_budget_bytes=96 * 1024)
    # H*W = 49 (not a multiple of 128): exercises lane padding + true-count stats.
    run_case(2, 8, 7, 7, jnp.float32)
    # bf16 input: dtype-aware sublane alignment (16) + lane padding.
    run_case(2, 32, 8, 8, jnp.bfloat16)

    print("KERNEL_OK")
</pallas_src>

<mosaic_0001>
module attributes {stable_mosaic.version = 11 : i64} {
  func.func @_bn_relu_single_pass_kernel(%arg0: i32, %arg1: memref<2x4x256xf32, #tpu.memory_space<vmem>>, %arg2: memref<4x1xf32, #tpu.memory_space<vmem>>, %arg3: memref<4x1xf32, #tpu.memory_space<vmem>>, %arg4: memref<2x4x256xf32, #tpu.memory_space<vmem>>) attributes {dimension_semantics = [#tpu.dimension_semantics<parallel>], iteration_bounds = array<i64: 1>, scalar_prefetch = 0 : i64, scratch_operands = 0 : i64, tpu.core_type = #tpu.core_type<tc>, window_params = [{transform_indices = @transform_0, window_bounds = array<i64: 2, 4, 256>}, {transform_indices = @transform_1, window_bounds = array<i64: 4, 1>}, {transform_indices = @transform_2, window_bounds = array<i64: 4, 1>}, {transform_indices = @transform_3, window_bounds = array<i64: 2, 4, 256>}]} {
    %c0 = arith.constant 0 : index
    %c0_0 = arith.constant 0 : index
    %c0_1 = arith.constant 0 : index
    %0 = vector.load %arg1[%c0, %c0_0, %c0_1] : memref<2x4x256xf32, #tpu.memory_space<vmem>>, vector<2x4x256xf32>
    %cst = arith.constant dense<0.000000e+00> : vector<4x256xf32>
    %1 = vector.multi_reduction <add>, %0, %cst [0] : vector<2x4x256xf32> to vector<4x256xf32>
    %cst_2 = arith.constant dense<0.000000e+00> : vector<4xf32>
    %2 = vector.multi_reduction <add>, %1, %cst_2 [1] : vector<4x256xf32> to vector<4xf32>
    %3 = vector.shape_cast %2 : vector<4xf32> to vector<4x1xf32>
    %4 = arith.mulf %0, %0 : vector<2x4x256xf32>
    %cst_3 = arith.constant dense<0.000000e+00> : vector<4x256xf32>
    %5 = vector.multi_reduction <add>, %4, %cst_3 [0] : vector<2x4x256xf32> to vector<4x256xf32>
    %cst_4 = arith.constant dense<0.000000e+00> : vector<4xf32>
    %6 = vector.multi_reduction <add>, %5, %cst_4 [1] : vector<4x256xf32> to vector<4xf32>
    %7 = vector.shape_cast %6 : vector<4xf32> to vector<4x1xf32>
    %cst_5 = arith.constant 0.001953125 : f32
    %8 = vector.broadcast %cst_5 : f32 to vector<4x1xf32>
    %9 = arith.mulf %3, %8 : vector<4x1xf32>
    %cst_6 = arith.constant 0.001953125 : f32
    %10 = vector.broadcast %cst_6 : f32 to vector<4x1xf32>
    %11 = arith.mulf %7, %10 : vector<4x1xf32>
    %12 = arith.mulf %9, %9 : vector<4x1xf32>
    %13 = arith.subf %11, %12 : vector<4x1xf32>
    %cst_7 = arith.constant 0.000000e+00 : f32
    %14 = vector.broadcast %cst_7 : f32 to vector<4x1xf32>
    %15 = arith.maximumf %13, %14 : vector<4x1xf32>
    %cst_8 = arith.constant 9.99999974E-6 : f32
    %16 = vector.broadcast %cst_8 : f32 to vector<4x1xf32>
    %17 = arith.addf %15, %16 : vector<4x1xf32>
    %18 = math.rsqrt %17 : vector<4x1xf32>
    %c0_9 = arith.constant 0 : index
    %c0_10 = arith.constant 0 : index
    %19 = vector.load %arg2[%c0_9, %c0_10] : memref<4x1xf32, #tpu.memory_space<vmem>>, vector<4x1xf32>
    %20 = arith.mulf %19, %18 : vector<4x1xf32>
    %c0_11 = arith.constant 0 : index
    %c0_12 = arith.constant 0 : index
    %21 = vector.load %arg3[%c0_11, %c0_12] : memref<4x1xf32, #tpu.memory_space<vmem>>, vector<4x1xf32>
    %22 = arith.mulf %9, %20 : vector<4x1xf32>
    %23 = arith.subf %21, %22 : vector<4x1xf32>
    %c0_13 = arith.constant 0 : index
    %c0_14 = arith.constant 0 : index
    %c0_15 = arith.constant 0 : index
    %24 = vector.load %arg1[%c0_13, %c0_14, %c0_15] : memref<2x4x256xf32, #tpu.memory_space<vmem>>, vector<2x4x256xf32>
    %25 = vector.shape_cast %20 : vector<4x1xf32> to vector<1x4x1xf32>
    %26 = vector.broadcast %25 : vector<1x4x1xf32> to vector<2x4x256xf32>
    %27 = arith.mulf %24, %26 : vector<2x4x256xf32>
    %28 = vector.shape_cast %23 : vector<4x1xf32> to vector<1x4x1xf32>
    %29 = vector.broadcast %28 : vector<1x4x1xf32> to vector<2x4x256xf32>
    %30 = arith.addf %27, %29 : vector<2x4x256xf32>
    %cst_16 = arith.constant 0.000000e+00 : f32
    %31 = vector.broadcast %cst_16 : f32 to vector<2x4x256xf32>
    %32 = arith.maximumf %30, %31 : vector<2x4x256xf32>
    %c0_17 = arith.constant 0 : index
    %c0_18 = arith.constant 0 : index
    %c0_19 = arith.constant 0 : index
    %33 = vector.load %arg4[%c0_17, %c0_18, %c0_19] : memref<2x4x256xf32, #tpu.memory_space<vmem>>, vector<2x4x256xf32>
    tpu.vector_store %arg4[%c0_17, %c0_18, %c0_19], %32 {strides = array<i32>} : memref<2x4x256xf32, #tpu.memory_space<vmem>>, vector<2x4x256xf32>,
    return
  }
  func.func @transform_0(%arg0: i32) -> (i32, i32, i32) {
    %c0_i32 = arith.constant 0 : i32
    %c0_i32_0 = arith.constant 0 : i32
    %c0_i32_1 = arith.constant 0 : i32
    return %c0_i32, %arg0, %c0_i32_0 : i32, i32, i32
  }
  func.func @transform_1(%arg0: i32) -> (i32, i32) {
    %c0_i32 = arith.constant 0 : i32
    %c0_i32_0 = arith.constant 0 : i32
    return %arg0, %c0_i32 : i32, i32
  }
  func.func @transform_2(%arg0: i32) -> (i32, i32) {
    %c0_i32 = arith.constant 0 : i32
    %c0_i32_0 = arith.constant 0 : i32
    return %arg0, %c0_i32 : i32, i32
  }
  func.func @transform_3(%arg0: i32) -> (i32, i32, i32) {
    %c0_i32 = arith.constant 0 : i32
    %c0_i32_0 = arith.constant 0 : i32
    %c0_i32_1 = arith.constant 0 : i32
    return %c0_i32, %arg0, %c0_i32_0 : i32, i32, i32
  }
}

</mosaic_0001>

<bundles_post_ra>
// kernel: tpu_custom_call.1
= control target key start
LH: loop header
LB: loop body
LE: loop exit
PB: predicated region body
PF: predicated region fallthrough
CT: control target
= control target key end

     0   :  { %8 = vsyncpa [#allocation3], 0  ;;  %s241_s0 = inlined_call_operand.hbm [shape: f32[2,4,256], index: 0, kind: input, shape index: {}]   ;;  %s242_s1 = inlined_call_operand.vmem [shape: f32[4,1], index: 1, kind: input, shape index: {}]   ;;  %s243_s2 = inlined_call_operand.vmem [shape: f32[4,1], index: 2, kind: input, shape index: {}]   ;;  %s244_s3 = inlined_call_operand.hbm [shape: f32[2,4,256], index: 3, kind: output, shape index: {}]  }
   0x1   :  { %9 = vsyncpa [#allocation4], 0  ;;  %s185_s12 = smov [#allocation2]  }
   0x2   :  { %s15_s13 = sshll.u32 %s185_s12, 4  ;;  %s16_s13 = int_to_ptr.vmem [resolvable:$true] %s15_s13 }
   0x3   :  { %s149_s14 = scalar_lea.vmem %s16_s13, 256  ;;  %p154_p1 = scmp.lt.s32.totalorder %s16_s13, %s16_s13 }
   0x4   :  { %p150_p0 = scmp.ne.s32.totalorder %s16_s13, %s149_s14  ;;  %p155_p2 = scmp.lt.s32.totalorder %s149_s14, %s149_s14 }
   0x6   :  { %p156_p3 = por %p155_p2, %p154_p1 }
   0x8   :  { %p157_p4 = pnand %p156_p3, %p150_p0 }
   0xa   :  { %160 = shalt.err (!%p157_p4)
}
   0xb   :  { %s186_s15 = smov 128   ;;  %s187_s16 = smov 8  }
   0xc   :  { %21 = dma.hbm_to_vmem [thread:$0]  %s241_s0, 256, %s16_s13, [#allocation3], %s186_s15, %s186_s15, %s187_s16  }
   0xd   :  { %181 = dma.done.wait [#allocation3], 256  }
   0xe   :  { %182 = vsyncadd [#allocation3], 4294967040  ;;  %vm37_vm0 = vcmask 1043456   ;;  %v29_v0 = vld [vmem:[#allocation2] sm:$0xff]  ;;  %v30_v1 = vld [vmem:[#allocation2 + $0x8] sm:$0xff]  ;;  %v188_v26 = vmov 0   ;;  %v87_v43 = vlaneseq }
   0xf   :  { %v33_v2 = vcombine.high %v29_v0, %v29_v0  ;;  %v34_v3 = vcombine.high %v30_v1, %v30_v1  ;;  %v38_v4 = vsel %vm37_vm0, %v29_v0, 0.0  ;;  %v39_v5 = vsel %vm37_vm0, %v30_v1, 0.0  ;;  %135 = vset.pattern.permute.xlu1 %v188_v26  ;;  %136 = vset.pattern.permute.xlu0 %v188_v26  ;;  %v75_v35 = vld [vmem:[%s242_s1] sm:$0xf]  ;;  %s190_s1 = smov [#allocation5]  }
  0x10   :  { %v40_v6 = vadd.f32 %v39_v5, %v38_v4  ;;  %v49_v7 = vmul.f32 %v29_v0, %v29_v0  ;;  %v50_v8 = vmul.f32 %v30_v1, %v30_v1  ;;  %v77_v38 = vld [vmem:[%s243_s2] sm:$0xf]  ;;  %v189_v41 = vmov 839922192   ;;  %s117_s22 = sshll.u32 %s190_s1, 4  ;;  %s118_s22 = int_to_ptr.vmem [resolvable:$true] %s117_s22 }
  0x11   :  { %v41_v9 = vsel %vm37_vm0, %v33_v2, 0.0  ;;  %v42_v10 = vsel %vm37_vm0, %v34_v3, 0.0  ;;  %v85_v42 = vunpack.c.l.s4 %v189_v41  ;;  %v88_v45 = vshrl.u32 %v87_v43, 7  ;;  %s161_s2 = scalar_lea.vmem %s118_s22, 256  ;;  %p166_p6 = scmp.lt.s32.totalorder %s118_s22, %s118_s22 }
  0x12   :  { %v43_v11 = vadd.f32 %v42_v10, %v41_v9  ;;  %v44_v12 = vsel %vm37_vm0, %v40_v6, 0.0  ;;  %v53_v13 = vcombine.high %v49_v7, %v49_v7  ;;  %v54_v14 = vcombine.high %v50_v8, %v50_v8  ;;  %p162_p5 = scmp.ne.s32.totalorder %s118_s22, %s161_s2  ;;  %p167_p7 = scmp.lt.s32.totalorder %s161_s2, %s161_s2 }
  0x13   :  { %v57_v15 = vsel %vm37_vm0, %v49_v7, 0.0  ;;  %v58_v16 = vsel %vm37_vm0, %v50_v8, 0.0  ;;  %v86_v44 = vunpack.c.0.s8 %v85_v42 }
  0x14   :  { %v45_v17 = vsel %vm37_vm0, %v43_v11, 0.0  ;;  %v59_v18 = vadd.f32 %v58_v16, %v57_v15  ;;  %v60_v19 = vsel %vm37_vm0, %v53_v13, 0.0  ;;  %v61_v20 = vsel %vm37_vm0, %v54_v14, 0.0  ;;  %p168_p8 = por %p167_p7, %p166_p6 }
  0x15   :  { %v46_v21 = vadd.f32 %v45_v17, %v44_v12  ;;  %v62_v22 = vadd.f32 %v61_v20, %v60_v19  ;;  %v89_v46 = vsub.s32 %v86_v44, %v88_v45 }
  0x16   :  { %v63_v23 = vsel %vm37_vm0, %v59_v18, 0.0  ;;  %p169_p9 = pnand %p168_p8, %p162_p5 }
  0x17   :  { %47 = vadd.xlane.f32.xlu0 %v46_v21  ;;  %v64_v24 = vsel %vm37_vm0, %v62_v22, 0.0 }
  0x18   :  { %v65_v25 = vadd.f32 %v64_v24, %v63_v23 }
  0x1b   :  { %66 = vadd.xlane.f32.xlu0 %v65_v25 }
  0xa0   :  { %v48_v27 = vpop.xlane.xlu0 %47 }
  0xa1   :  { %v68_v28 = vmul.f32 0.001953125, %v48_v27 }
  0xa3   :  { %v70_v30 = vmul.f32 %v68_v28, %v68_v28 }
  0xa4   :  { %v67_v29 = vpop.xlane.xlu0 %66 }
  0xa5   :  { %v69_v31 = vmul.f32 0.001953125, %v67_v29 }
  0xa7   :  { %v71_v32 = vsub.f32 %v69_v31, %v70_v30 }
  0xa9   :  { %v72_v33 = vmax.f32 %v71_v32, 0.0 }
  0xab   :  { %v73_v34 = vadd.f32 1e-05, %v72_v33 }
  0xad   :  { %139 = vrsqrt.f32 %v73_v34 }
  0xba   :  { %v140_v36 = vpop.eup %139 }
  0xbb   :  { %v76_v37 = vmul.f32 %v140_v36, %v75_v35 }
  0xbd   :  { %82 = vperm.xlu1 %135, %v76_v37   ;;  %v78_v39 = vmul.f32 %v76_v37, %v68_v28 }
  0xbf   :  { %v79_v40 = vsub.f32 %v77_v38, %v78_v39 }
  0xc1   :  { %96 = vperm.xlu1 %135, %v79_v40  }
 0x138   :  { %v83_v47 = vpop.permute.xlu1 %82 }
 0x139   :  { %v90_v48 = vrot.slane %v83_v47, %v89_v46 }
 0x13b   :  { %v92_v50 = vmul.f32 %v90_v48, %v29_v0  ;;  %v93_v51 = vmul.f32 %v90_v48, %v30_v1 }
 0x13c   :  { %v97_v49 = vpop.permute.xlu1 %96 }
 0x13d   :  { %v104_v52 = vrot.slane %v97_v49, %v89_v46 }
 0x13f   :  { %v106_v53 = vadd.f32 %v104_v52, %v92_v50  ;;  %v107_v54 = vadd.f32 %v104_v52, %v93_v51 }
 0x141   :  { %v108_v55 = vmax.f32 %v106_v53, 0.0  ;;  %v109_v56 = vmax.f32 %v107_v54, 0.0 }
 0x143   :  { %110 = vst [vmem:[#allocation5] sm:$0xff] %v108_v55  ;;  %111 = vst [vmem:[#allocation5 + $0x8] sm:$0xff] %v109_v56 }
 0x144   :  { %172 = shalt.err (!%p169_p9)
}
 0x145   :  { %123 = dma.vmem_to_hbm [thread:$0]  %s118_s22, 256, %s244_s3, [#allocation4], %s186_s15, %s186_s15, %s187_s16  }
 0x146   :  { %183 = dma.done.wait [#allocation4], 256  }
 0x147   :  { %184 = vsyncadd [#allocation4], 4294967040 }
 0x148   :  { %127 = vsyncpa [#allocation3], 1 }
 0x149   :  { %128 = vsyncpa [#allocation4], 1 }

</bundles_post_ra>
